<compile_context>
chip_gen: v5e
topology: v5e:2x2
jax: 0.10.0
libtpu: 0.0.40
codegen_flags: <defaults>
</compile_context>

<pallas_src>
import jax
import jax.numpy as jnp
from jax.experimental import pallas as pl
from jax.experimental.pallas import tpu as pltpu


def _round_up(n, m):
    return ((n + m - 1) // m) * m


def _net_kernel(x_ref, w1_ref, b1_ref, w2_ref, b2_ref, o_ref):
    # hidden1: x @ W1 + b1, ReLU  (MXU matmul, f32 accumulation)
    h = jnp.dot(x_ref[...], w1_ref[...], preferred_element_type=jnp.float32)
    h = jnp.maximum(h + b1_ref[...], 0.0)          # f32 elementwise (v5e-safe)

    # predict: h @ W2 + b2 (cast h to the weight dtype so bf16 weights keep
    # the second matmul on the fast MXU path; accumulate in f32)
    logits = jnp.dot(h.astype(w2_ref.dtype), w2_ref[...],
                     preferred_element_type=jnp.float32)
    logits = logits + b2_ref[...]

    # Numerically stable softmax along the last dim (exact division so rows
    # sum to 1 to fp32 precision).
    m = jnp.max(logits, axis=-1, keepdims=True)
    e = jnp.exp(logits - m)
    denom = jnp.sum(e, axis=-1, keepdims=True)
    o_ref[...] = (e / denom).astype(o_ref.dtype)


def net_forward(x, w1, b1, w2, b2, *, block_b=1024, matmul_dtype=jnp.float32):
    """Forward pass of Net. x: (B, F); w1: (F, H); b1: (H,)/(1,H); w2: (H, O); b2: (O,)/(1,O)."""
    B, F = x.shape
    H = w1.shape[1]
    O = w2.shape[1]

    # Dtype-aware batch tile: sublane multiple is 16 for bf16, 8 for f32.
    sub = 16 if jnp.dtype(matmul_dtype) == jnp.dtype(jnp.bfloat16) else 8
    tb = _round_up(max(1, min(block_b, B)), sub)
    Bp = _round_up(B, tb)
    if Bp // tb == 1 and tb >= 2 * sub:
        # Guarantee >= 2 grid steps so the "parallel" batch axis can shard
        # across the two TensorCores on v7x (no-op cost on v5e/v6e).
        tb = _round_up(pl.cdiv(Bp, 2), sub)
        Bp = _round_up(B, tb)

    # Only the batch dim is ever padded (to a tile multiple); feature, hidden
    # and output dims are passed unpadded -- blocks whose last dims equal the
    # full array dims are legal even below (8, 128).
    if Bp != B:
        xp = jnp.zeros((Bp, F), matmul_dtype).at[:B].set(x.astype(matmul_dtype))
    else:
        xp = x.astype(matmul_dtype)
    w1c = w1.astype(matmul_dtype)
    w2c = w2.astype(matmul_dtype)
    b1c = b1.reshape(1, H).astype(jnp.float32)
    b2c = b2.reshape(1, O).astype(jnp.float32)

    grid = (Bp // tb,)
    itemsize = jnp.dtype(matmul_dtype).itemsize
    bytes_accessed = (
        Bp * F * itemsize                       # x in
        + (F * H + H * O) * itemsize            # weights
        + (H + O) * 4                           # biases
        + Bp * O * 4                            # output
    )
    cost = pl.CostEstimate(
        flops=2 * Bp * (F * H + H * O),
        transcendentals=Bp * O,
        bytes_accessed=bytes_accessed,
    )

    # VMEM footprint: double-buffered x/out tiles + (double-buffered, since
    # pipelined by default) resident weights/biases.  Only override the
    # scoped limit when the default could be too small (v5e default: 16 MiB).
    vmem_need = (
        2 * tb * F * itemsize
        + 2 * tb * O * 4
        + 2 * (F * H + H * O) * itemsize
        + 2 * (H + O) * 4
    )
    compiler_kwargs = dict(dimension_semantics=("parallel",))
    if vmem_need > 12 * 1024 * 1024:
        # Cap at 64 MiB so the request stays within v7x physical VMEM.
        compiler_kwargs["vmem_limit_bytes"] = int(
            min(2 * vmem_need, 64 * 1024 * 1024))
    # TODO(synk): for very large H/O on v7x, single-buffer the constant-index
    # weight specs (pipeline_mode=pl.Buffered(1)) and/or add a K grid axis.

    out = pl.pallas_call(
        _net_kernel,
        out_shape=jax.ShapeDtypeStruct((Bp, O), jnp.float32),
        grid_spec=pltpu.PrefetchScalarGridSpec(
            num_scalar_prefetch=0,
            grid=grid,
            in_specs=[
                pl.BlockSpec((tb, F), lambda i: (i, 0)),   # x: tiled over batch
                pl.BlockSpec((F, H), lambda i: (0, 0)),    # W1: VMEM-resident
                pl.BlockSpec((1, H), lambda i: (0, 0)),    # b1: VMEM-resident
                pl.BlockSpec((H, O), lambda i: (0, 0)),    # W2: VMEM-resident
                pl.BlockSpec((1, O), lambda i: (0, 0)),    # b2: VMEM-resident
            ],
            out_specs=pl.BlockSpec((tb, O), lambda i: (i, 0)),
        ),
        compiler_params=pltpu.CompilerParams(**compiler_kwargs),
        cost_estimate=cost,
    )(xp, w1c, b1c, w2c, b2c)

    return out[:B] if Bp != B else out


def init_linear(key, fan_in, fan_out):
    # Deterministic init mimicking torch.nn.Linear default (uniform +/- 1/sqrt(fan_in)).
    kw, kb = jax.random.split(key)
    bound = 1.0 / jnp.sqrt(jnp.float32(fan_in))
    w = jax.random.uniform(kw, (fan_in, fan_out), jnp.float32, -bound, bound)
    b = jax.random.uniform(kb, (1, fan_out), jnp.float32, -bound, bound)
    return w, b


if __name__ == "__main__":
    key = jax.random.PRNGKey(0)
    k_x, k_l1, k_l2 = jax.random.split(key, 3)

    batch, n_feature, n_hidden, n_output = 64, 16, 32, 8
    x = jax.random.normal(k_x, (batch, n_feature), jnp.float32)
    w1, b1 = init_linear(k_l1, n_feature, n_hidden)
    w2, b2 = init_linear(k_l2, n_hidden, n_output)

    # Plain-JAX reference.
    h_ref = jnp.maximum(x @ w1 + b1, 0.0)
    ref = jax.nn.softmax(h_ref @ w2 + b2, axis=-1)

    # f32 matmul path; block_b=32 exercises a 2-step, pipelined batch grid.
    out = net_forward(x, w1, b1, w2, b2, block_b=32, matmul_dtype=jnp.float32)
    out = jax.block_until_ready(out)
    assert out.shape == (batch, n_output)
    assert jnp.allclose(out, ref, atol=1e-4, rtol=1e-4), "mismatch vs reference (f32)"
    assert jnp.allclose(jnp.sum(out, axis=-1), 1.0, atol=1e-5), "softmax rows must sum to ~1"

    # bf16 matmul path (recommended at scale on v6e/v7x); looser tolerance.
    out_bf16 = jax.block_until_ready(
        net_forward(x, w1, b1, w2, b2, block_b=32, matmul_dtype=jnp.bfloat16))
    assert out_bf16.shape == (batch, n_output)
    assert jnp.allclose(out_bf16, ref, atol=5e-2), "mismatch vs reference (bf16)"

    print("KERNEL_OK")
</pallas_src>

<mosaic_0001>
module attributes {stable_mosaic.version = 11 : i64} {
  func.func @_net_kernel(%arg0: i32, %arg1: memref<32x16xf32, #tpu.memory_space<vmem>>, %arg2: memref<16x32xf32, #tpu.memory_space<vmem>>, %arg3: memref<1x32xf32, #tpu.memory_space<vmem>>, %arg4: memref<32x8xf32, #tpu.memory_space<vmem>>, %arg5: memref<1x8xf32, #tpu.memory_space<vmem>>, %arg6: memref<32x8xf32, #tpu.memory_space<vmem>>) attributes {dimension_semantics = [#tpu.dimension_semantics<parallel>], iteration_bounds = array<i64: 2>, scalar_prefetch = 0 : i64, scratch_operands = 0 : i64, tpu.core_type = #tpu.core_type<tc>, window_params = [{transform_indices = @transform_0, window_bounds = array<i64: 32, 16>}, {pipeline_mode = #tpu.pipeline_mode<synchronous>, transform_indices = @transform_1, window_bounds = array<i64: 16, 32>}, {pipeline_mode = #tpu.pipeline_mode<synchronous>, transform_indices = @transform_2, window_bounds = array<i64: 1, 32>}, {pipeline_mode = #tpu.pipeline_mode<synchronous>, transform_indices = @transform_3, window_bounds = array<i64: 32, 8>}, {pipeline_mode = #tpu.pipeline_mode<synchronous>, transform_indices = @transform_4, window_bounds = array<i64: 1, 8>}, {transform_indices = @transform_5, window_bounds = array<i64: 32, 8>}]} {
    %c0 = arith.constant 0 : index
    %c0_0 = arith.constant 0 : index
    %0 = vector.load %arg1[%c0, %c0_0] : memref<32x16xf32, #tpu.memory_space<vmem>>, vector<32x16xf32>
    %c0_1 = arith.constant 0 : index
    %c0_2 = arith.constant 0 : index
    %1 = vector.load %arg2[%c0_1, %c0_2] : memref<16x32xf32, #tpu.memory_space<vmem>>, vector<16x32xf32>
    %cst = arith.constant dense<0.000000e+00> : vector<32x32xf32>
    %2 = tpu.matmul %0, %1, %cst {dimension_numbers = #tpu.dot_dimension_numbers<[1], [0], [0], [1], [0, 0, 1, 1], [], []>} : vector<32x16xf32>, vector<16x32xf32>, vector<32x32xf32> -> vector<32x32xf32>
    %c0_3 = arith.constant 0 : index
    %c0_4 = arith.constant 0 : index
    %3 = vector.load %arg3[%c0_3, %c0_4] : memref<1x32xf32, #tpu.memory_space<vmem>>, vector<1x32xf32>
    %4 = vector.broadcast %3 : vector<1x32xf32> to vector<32x32xf32>
    %5 = arith.addf %2, %4 : vector<32x32xf32>
    %cst_5 = arith.constant 0.000000e+00 : f32
    %6 = vector.broadcast %cst_5 : f32 to vector<32x32xf32>
    %7 = arith.maximumf %5, %6 : vector<32x32xf32>
    %c0_6 = arith.constant 0 : index
    %c0_7 = arith.constant 0 : index
    %8 = vector.load %arg4[%c0_6, %c0_7] : memref<32x8xf32, #tpu.memory_space<vmem>>, vector<32x8xf32>
    %cst_8 = arith.constant dense<0.000000e+00> : vector<32x8xf32>
    %9 = tpu.matmul %7, %8, %cst_8 {dimension_numbers = #tpu.dot_dimension_numbers<[1], [0], [0], [1], [0, 0, 1, 1], [], []>} : vector<32x32xf32>, vector<32x8xf32>, vector<32x8xf32> -> vector<32x8xf32>
    %c0_9 = arith.constant 0 : index
    %c0_10 = arith.constant 0 : index
    %10 = vector.load %arg5[%c0_9, %c0_10] : memref<1x8xf32, #tpu.memory_space<vmem>>, vector<1x8xf32>
    %11 = vector.broadcast %10 : vector<1x8xf32> to vector<32x8xf32>
    %12 = arith.addf %9, %11 : vector<32x8xf32>
    %cst_11 = arith.constant dense<0xFF800000> : vector<32xf32>
    %13 = vector.multi_reduction <maximumf>, %12, %cst_11 [1] : vector<32x8xf32> to vector<32xf32>
    %14 = vector.shape_cast %13 : vector<32xf32> to vector<32x1xf32>
    %15 = vector.broadcast %14 : vector<32x1xf32> to vector<32x8xf32>
    %16 = arith.subf %12, %15 : vector<32x8xf32>
    %17 = math.exp %16 : vector<32x8xf32>
    %cst_12 = arith.constant dense<0.000000e+00> : vector<32xf32>
    %18 = vector.multi_reduction <add>, %17, %cst_12 [1] : vector<32x8xf32> to vector<32xf32>
    %19 = vector.shape_cast %18 : vector<32xf32> to vector<32x1xf32>
    %20 = vector.broadcast %19 : vector<32x1xf32> to vector<32x8xf32>
    %21 = arith.divf %17, %20 : vector<32x8xf32>
    %c0_13 = arith.constant 0 : index
    %c0_14 = arith.constant 0 : index
    %22 = vector.load %arg6[%c0_13, %c0_14] : memref<32x8xf32, #tpu.memory_space<vmem>>, vector<32x8xf32>
    tpu.vector_store %arg6[%c0_13, %c0_14], %21 {strides = array<i32>} : memref<32x8xf32, #tpu.memory_space<vmem>>, vector<32x8xf32>,
    return
  }
  func.func @transform_0(%arg0: i32) -> (i32, i32) {
    %c0_i32 = arith.constant 0 : i32
    %c0_i32_0 = arith.constant 0 : i32
    return %arg0, %c0_i32 : i32, i32
  }
  func.func @transform_1(%arg0: i32) -> (i32, i32) {
    %c0_i32 = arith.constant 0 : i32
    %c0_i32_0 = arith.constant 0 : i32
    %c0_i32_1 = arith.constant 0 : i32
    return %c0_i32, %c0_i32_0 : i32, i32
  }
  func.func @transform_2(%arg0: i32) -> (i32, i32) {
    %c0_i32 = arith.constant 0 : i32
    %c0_i32_0 = arith.constant 0 : i32
    %c0_i32_1 = arith.constant 0 : i32
    return %c0_i32, %c0_i32_0 : i32, i32
  }
  func.func @transform_3(%arg0: i32) -> (i32, i32) {
    %c0_i32 = arith.constant 0 : i32
    %c0_i32_0 = arith.constant 0 : i32
    %c0_i32_1 = arith.constant 0 : i32
    return %c0_i32, %c0_i32_0 : i32, i32
  }
  func.func @transform_4(%arg0: i32) -> (i32, i32) {
    %c0_i32 = arith.constant 0 : i32
    %c0_i32_0 = arith.constant 0 : i32
    %c0_i32_1 = arith.constant 0 : i32
    return %c0_i32, %c0_i32_0 : i32, i32
  }
  func.func @transform_5(%arg0: i32) -> (i32, i32) {
    %c0_i32 = arith.constant 0 : i32
    %c0_i32_0 = arith.constant 0 : i32
    return %arg0, %c0_i32 : i32, i32
  }
}

</mosaic_0001>

<bundles_post_ra>
// kernel: tpu_custom_call.1
= control target key start
LH: loop header
LB: loop body
LE: loop exit
PB: predicated region body
PF: predicated region fallthrough
CT: control target
= control target key end

     0   :  { %s580_s18 = smov 0   ;;  %s654_s0 = inlined_call_operand.vmem [shape: f32[64,16], index: 0, kind: input, shape index: {}]   ;;  %s655_s1 = inlined_call_operand.vmem [shape: f32[16,32], index: 1, kind: input, shape index: {}]   ;;  %s656_s2 = inlined_call_operand.vmem [shape: f32[1,32], index: 2, kind: input, shape index: {}]   ;;  %s657_s3 = inlined_call_operand.vmem [shape: f32[32,8], index: 3, kind: input, shape index: {}]   ;;  %s658_s4 = inlined_call_operand.vmem [shape: f32[1,8], index: 4, kind: input, shape index: {}]   ;;  %s659_s5 = inlined_call_operand.vmem [shape: f32[64,8], index: 5, kind: output, shape index: {}]  }
   0x1 LB: > { %s491_s19 = sadd.s32 4294967295, %s548_s18   ;;  %p495_p0 = scmp.ge.s32.totalorder %s548_s18, 1  ;;  %s548_s18 = sphi %s580_s18, %s15_s18  }
   0x2   : > { %p188_p1 = scmp.lt.s32.totalorder %s548_s18, 3 }
   0x4   : > { %p189_p2 = pnand %p495_p0, %p188_p1 }
   0x5   : > { %s496_s24 = sshll.u32 (!%p189_p2), %s491_s19, 2 }
   0x6   : > { %192 = sbr.rel (%p189_p2) target bundleno = 566 (0x236), region = 40  ;;  %p217_p3 = scmp.lt.s32.totalorder (!%p189_p2), %s496_s24, 7 }
   0xb   : > { %v233_v0 = vld [vmem:[%s655_s1 + $0x8] sm:$0xff]  ;;  %v232_v1 = vld [vmem:[%s655_s1] sm:$0xff]  ;;  %v287_v2 = vld [vmem:[%s657_s3 + $0x18] sm:$0xff]  ;;  %s661_s24 = smov (!%p217_p3, %s496_s24), 7  ;;  %vm238_vm0 = vcmask 130048   ;;  %vm292_vm1 = vcmask 261120  }
   0xc   : > { %265 = vmatpush.msra.mxu0 %v233_v0  ;;  %510 = vmatpush.msra.mxu3 %v233_v0  ;;  %s497_s27 = sshll.u32 %s661_s24, 3  ;;  %v286_v7 = vld [vmem:[%s657_s3 + $0x10] sm:$0xff]  ;;  %v285_v8 = vld [vmem:[%s657_s3 + $0x8] sm:$0xff]  ;;  %v284_v9 = vld [vmem:[%s657_s3] sm:$0xff]  ;;  %vm334_vm2 = vcmask 64512  }
   0xd   : > { %317 = vmatpush.msra.mxu1 %v287_v2  ;;  %512 = vmatpush.msra.mxu2 %v287_v2  ;;  %s220_s30 = scalar_lea.vmem %s654_s0, %s497_s27  ;;  %v524_v10 = vld [vmem:[%s656_s2] ss:$0 sm:$0xff]  ;;  %s639_s19 = scalar_lea.vmem %s659_s5, %s497_s27 }
   0xe   : > { %266 = vmatpush.msra.mxu0 %v232_v1  ;;  %511 = vmatpush.msra.mxu3 %v232_v1  ;;  %v228_v3 = vld [vmem:[%s220_s30] sm:$0xff]  ;;  %v229_v4 = vld [vmem:[%s220_s30 + $0x8] sm:$0xff]  ;;  %v230_v5 = vld [vmem:[%s220_s30 + $0x10] sm:$0xff] }
   0xf   : > { %500 = vmatmul.msk.f32.vlgmr.msra.gmra.mxu0 %vm238_vm0, %v228_v3  ;;  %501 = vmatmul.msk.f32.vlgmr.msra.gmra.mxu3 %vm238_vm0, %v229_v4  ;;  %v231_v6 = vld [vmem:[%s220_s30 + $0x18] sm:$0xff]  ;;  %v525_v23 = vld [vmem:[%s658_s4] ss:$0 sm:$0xff] }
  0x10   : > { %318 = vmatpush.msra.mxu1 %v286_v7  ;;  %513 = vmatpush.msra.mxu2 %v286_v7 }
  0x12   : > { %319 = vmatpush.msra.mxu1 %v285_v8  ;;  %514 = vmatpush.msra.mxu2 %v285_v8 }
  0x14   : > { %320 = vmatpush.msra.mxu1 %v284_v9  ;;  %515 = vmatpush.msra.mxu2 %v284_v9 }
  0x17   : > { %502 = vmatmul.msk.f32.gmra.mxu3 %vm238_vm0, %v230_v5 }
  0x1f   : > { %503 = vmatmul.msk.f32.gmra.mxu3 %vm238_vm0, %v231_v6 }
  0x8c   : > { %v268_v11 = vpop.f32.mrf.mxu0 }
  0x8d   : > { %v269_v12 = vadd.f32 %v524_v10, %v268_v11 }
  0x8f   : > { %v280_v13 = vmax.f32 %v269_v12, 0.0 }
  0x91   : > { %504 = vmatmul.msk.f32.vlgmr.msra.gmra.mxu1 %vm292_vm1, %v280_v13 }
  0x92   : > { %v271_v14 = vpop.f32.mrf.mxu3 }
  0x93   : > { %v272_v15 = vadd.f32 %v524_v10, %v271_v14 }
  0x95   : > { %v281_v16 = vmax.f32 %v272_v15, 0.0 }
  0x99   : > { %505 = vmatmul.msk.f32.gmra.mxu1 %vm292_vm1, %v281_v16 }
  0x9a   : > { %v274_v17 = vpop.f32.mrf.mxu3 }
  0x9b   : > { %v275_v18 = vadd.f32 %v524_v10, %v274_v17 }
  0x9d   : > { %v282_v19 = vmax.f32 %v275_v18, 0.0 }
  0x9f   : > { %506 = vmatmul.msk.f32.vlgmr.msra.gmra.mxu2 %vm292_vm1, %v282_v19 }
  0xa2   : > { %v277_v20 = vpop.f32.mrf.mxu3 }
  0xa3   : > { %v278_v21 = vadd.f32 %v524_v10, %v277_v20 }
  0xa5   : > { %v283_v22 = vmax.f32 %v278_v21, 0.0 }
  0xa7   : > { %507 = vmatmul.msk.f32.gmra.mxu2 %vm292_vm1, %v283_v22 }
 0x10e   : > { %v322_v24 = vpop.f32.mrf.mxu1 }
 0x10f   : > { %v323_v25 = vadd.f32 %v525_v23, %v322_v24 }
 0x111   : > { %v335_v26 = vsel %vm334_vm2, %v323_v25, -inf }
 0x112   : > { %336 = vmax.xlane.f32.xlu0 %v335_v26 }
 0x116   : > { %v325_v27 = vpop.f32.mrf.mxu1 }
 0x117   : > { %v326_v28 = vadd.f32 %v525_v23, %v325_v27 }
 0x119   : > { %v338_v29 = vsel %vm334_vm2, %v326_v28, -inf }
 0x11a   : > { %339 = vmax.xlane.f32.xlu0 %v338_v29 }
 0x122   : > { %v328_v30 = vpop.f32.mrf.mxu2 }
 0x123   : > { %v329_v31 = vadd.f32 %v525_v23, %v328_v30 }
 0x125   : > { %v341_v32 = vsel %vm334_vm2, %v329_v31, -inf }
 0x126   : > { %342 = vmax.xlane.f32.xlu1 %v341_v32 }
 0x12a   : > { %v331_v33 = vpop.f32.mrf.mxu2 }
 0x12b   : > { %v332_v34 = vadd.f32 %v525_v23, %v331_v33 }
 0x12d   : > { %v344_v35 = vsel %vm334_vm2, %v332_v34, -inf }
 0x12e   : > { %345 = vmax.xlane.f32.xlu1 %v344_v35 }
 0x185   : > { %v337_v36 = vpop.xlane.xlu0 %336 }
 0x186   : > { %v347_v37 = vsub.f32 %v323_v25, %v337_v36 }
 0x188   : > { %v351_v38 = vmul.f32 1.442695, %v347_v37 }
 0x18a   : > { %526 = vpow2.f32 %v351_v38 }
 0x18d   : > { %v340_v39 = vpop.xlane.xlu0 %339 }
 0x18e   : > { %v348_v40 = vsub.f32 %v326_v28, %v340_v39 }
 0x190   : > { %v527_v41 = vpop.eup %526  ;;  %v353_v42 = vmul.f32 1.442695, %v348_v40 }
 0x191   : > { %v359_v43 = vsel %vm334_vm2, %v527_v41, 0.0 }
 0x192   : > { %528 = vpow2.f32 %v353_v42  ;;  %360 = vadd.xlane.f32.xlu2 %v359_v43 }
 0x198   : > { %v529_v44 = vpop.eup %528 }
 0x199   : > { %v343_v45 = vpop.xlane.xlu1 %342  ;;  %v362_v46 = vsel %vm334_vm2, %v529_v44, 0.0 }
 0x19a   : > { %v349_v47 = vsub.f32 %v329_v31, %v343_v45  ;;  %363 = vadd.xlane.f32.xlu2 %v362_v46 }
 0x19c   : > { %v355_v48 = vmul.f32 1.442695, %v349_v47 }
 0x19e   : > { %530 = vpow2.f32 %v355_v48 }
 0x1a1   : > { %v346_v49 = vpop.xlane.xlu1 %345 }
 0x1a2   : > { %v350_v50 = vsub.f32 %v332_v34, %v346_v49 }
 0x1a4   : > { %v626_v51 = vpop.eup %530  ;;  %v357_v52 = vmul.f32 1.442695, %v350_v50 }
 0x1a5   : > { %v365_v53 = vsel %vm334_vm2, %v626_v51, 0.0 }
 0x1a6   : > { %532 = vpow2.f32 %v357_v52  ;;  %366 = vadd.xlane.f32.xlu0 %v365_v53 }
 0x1ac   : > { %v630_v54 = vpop.eup %532 }
 0x1ad   : > { %v368_v55 = vsel %vm334_vm2, %v630_v54, 0.0 }
 0x1ae   : > { %369 = vadd.xlane.f32.xlu1 %v368_v55 }
 0x205   : > { %v361_v56 = vpop.xlane.xlu2 %360 }
 0x206   : > { %534 = vrcp.f32 %v361_v56  ;;  %v382_v61 = vand.u32 2147483648, %v361_v56  ;;  %v380_v63 = vand.u32 2147483647, %v361_v56  ;;  %vm376_vm4 = vweird.f32 %v361_v56 }
 0x208   : > { %v383_v2 = vor.u32 1.1754944e-38, %v382_v61  ;;  %vm381_vm6 = vcmp.eq.f32.partialorder %v380_v63, 8.507059e+37 }
 0x20c   : > { %v535_v57 = vpop.eup %534 }
 0x20d   : > { %v372_v58 = vmul.f32 %v535_v57, %v361_v56  ;;  %v364_v59 = vpop.xlane.xlu2 %363  ;;  %vm377_vm3 = vweird.f32 %v535_v57 }
 0x20e   : > { %536 = vrcp.f32 %v364_v59  ;;  %vm378_vm5 = vmor %vm376_vm4, %vm377_vm3  ;;  %v397_v8 = vand.u32 2147483648, %v364_v59  ;;  %v395_v10 = vand.u32 2147483647, %v364_v59  ;;  %vm391_vm8 = vweird.f32 %v364_v59 }
 0x20f   : > { %v373_v60 = vsub.f32 1.0, %v372_v58 }
 0x210   : > { %v398_v13 = vor.u32 1.1754944e-38, %v397_v8  ;;  %vm396_vm10 = vcmp.eq.f32.partialorder %v395_v10, 8.507059e+37 }
 0x211   : > { %v374_v62 = vmul.f32 %v535_v57, %v373_v60 }
 0x213   : > { %v375_v0 = vadd.f32 %v535_v57, %v374_v62 }
 0x214   : > { %v537_v1 = vpop.eup %536 }
 0x215   : > { %v379_v3 = vsel %vm378_vm5, %v535_v57, %v375_v0  ;;  %v387_v4 = vmul.f32 %v537_v1, %v364_v59  ;;  %vm392_vm7 = vweird.f32 %v537_v1 }
 0x216   : > { %v384_v5 = vsel %vm381_vm6, %v383_v2, %v379_v3  ;;  %vm393_vm9 = vmor %vm391_vm8, %vm392_vm7 }
 0x217   : > { %v385_v6 = vmul.f32 %v527_v41, %v384_v5  ;;  %v388_v7 = vsub.f32 1.0, %v387_v4 }
 0x219   : > { %431 = vst.msk [vmem:[%s639_s19] sm:$0xff] %vm334_vm2, %v385_v6  ;;  %v389_v9 = vmul.f32 %v537_v1, %v388_v7  ;;  %v367_v11 = vpop.xlane.xlu0 %366 }
 0x21a   : > { %538 = vrcp.f32 %v367_v11  ;;  %v412_v21 = vand.u32 2147483648, %v367_v11  ;;  %v410_v23 = vand.u32 2147483647, %v367_v11  ;;  %vm406_vm12 = vweird.f32 %v367_v11 }
 0x21b   : > { %v390_v12 = vadd.f32 %v537_v1, %v389_v9 }
 0x21c   : > { %v413_v26 = vor.u32 1.1754944e-38, %v412_v21  ;;  %vm411_vm14 = vcmp.eq.f32.partialorder %v410_v23, 8.507059e+37 }
 0x21d   : > { %v394_v14 = vsel %vm393_vm9, %v537_v1, %v390_v12 }
 0x21e   : > { %v399_v15 = vsel %vm396_vm10, %v398_v13, %v394_v14 }
 0x21f   : > { %v400_v16 = vmul.f32 %v529_v44, %v399_v15 }
 0x220   : > { %v539_v17 = vpop.eup %538 }
 0x221   : > { %432 = vst.msk [vmem:[%s639_s19 + $0x8] sm:$0xff] %vm334_vm2, %v400_v16  ;;  %v402_v18 = vmul.f32 %v539_v17, %v367_v11  ;;  %v370_v19 = vpop.xlane.xlu1 %369  ;;  %vm407_vm11 = vweird.f32 %v539_v17 }
 0x222   : > { %540 = vrcp.f32 %v370_v19  ;;  %vm408_vm13 = vmor %vm406_vm12, %vm407_vm11  ;;  %v427_v32 = vand.u32 2147483648, %v370_v19  ;;  %v425_v34 = vand.u32 2147483647, %v370_v19  ;;  %vm421_vm0 = vweird.f32 %v370_v19 }
 0x223   : > { %v403_v20 = vsub.f32 1.0, %v402_v18 }
 0x224   : > { %v428_v36 = vor.u32 1.1754944e-38, %v427_v32  ;;  %vm426_vm3 = vcmp.eq.f32.partialorder %v425_v34, 8.507059e+37 }
 0x225   : > { %v404_v22 = vmul.f32 %v539_v17, %v403_v20 }
 0x227   : > { %v405_v24 = vadd.f32 %v539_v17, %v404_v22 }
 0x228   : > { %v541_v25 = vpop.eup %540 }
 0x229   : > { %v409_v27 = vsel %vm408_vm13, %v539_v17, %v405_v24  ;;  %v417_v28 = vmul.f32 %v541_v25, %v370_v19  ;;  %vm422_vm15 = vweird.f32 %v541_v25 }
 0x22a   : > { %v414_v29 = vsel %vm411_vm14, %v413_v26, %v409_v27  ;;  %vm423_vm1 = vmor %vm421_vm0, %vm422_vm15 }
 0x22b   : > { %v415_v30 = vmul.f32 %v626_v51, %v414_v29  ;;  %v418_v31 = vsub.f32 1.0, %v417_v28 }
 0x22d   : > { %433 = vst.msk [vmem:[%s639_s19 + $0x10] sm:$0xff] %vm334_vm2, %v415_v30  ;;  %v419_v33 = vmul.f32 %v541_v25, %v418_v31 }
 0x22f   : > { %v420_v35 = vadd.f32 %v541_v25, %v419_v33 }
 0x231   : > { %v424_v37 = vsel %vm423_vm1, %v541_v25, %v420_v35 }
 0x232   : > { %v429_v38 = vsel %vm426_vm3, %v428_v36, %v424_v37 }
 0x233   : > { %v430_v39 = vmul.f32 %v630_v54, %v429_v38 }
 0x235   : > { %434 = vst.msk [vmem:[%s639_s19 + $0x18] sm:$0xff] %vm334_vm2, %v430_v39 }
 0x236 PF: > { %s15_s18 = sadd.s32 1, %s548_s18  }
 0x237   : > { %p12_p4 = scmp.ge.s32.totalorder %s15_s18, 4  }
 0x239   :  { %14 = sbr.rel (!%p12_p4) target bundleno = 1 (0x1), region = 70 }

</bundles_post_ra>
